<compile_context>
chip_gen: v7x
topology: tpu7x:2x2x1
jax: 0.10.0
libtpu: 0.0.40
codegen_flags: <defaults>
</compile_context>

<pallas_src>
import jax
import jax.numpy as jnp
from jax.experimental import pallas as pl
from jax.experimental.pallas import tpu as pltpu


# -----------------------------------------------------------------------------
# Pallas kernel: one grid step per TB-sized batch tile.
# -----------------------------------------------------------------------------
def sentence_cnn_kernel(x_ref, wdw_ref, w1_ref, beff_ref, out_ref):
    TB, L, E = x_ref.shape
    F = w1_ref.shape[1]                    # 256 = 4 * E
    R = TB * L

    x = x_ref[...].reshape(R, E)           # (TB*L, 64) f32, E on lanes

    # Within-sentence position of each flattened row (periodic with period L);
    # used to zero out rolled elements that fall outside [0, L) per sentence.
    l_idx = jax.lax.broadcasted_iota(jnp.int32, (TB, L, E), 1).reshape(R, E)

    # 9 unique shifted windows, shared by all four dilation branches:
    #   shifted[s][r] = x_sentence[l + s]  (zero where l + s is out of range).
    # pltpu.roll lands on the otherwise-idle XLU slot; roll wrap-around across
    # sentence boundaries is killed by the mask.  pltpu.roll only accepts
    # non-negative shifts, so "roll by -s" is written as "roll by R - s".
    shifted = {0: x}
    for s in (1, 2, 3, 4):
        fwd = pltpu.roll(x, shift=R - s, axis=0)         # fwd[r] = x[(r + s) % R]
        shifted[s] = jnp.where(l_idx < L - s, fwd, 0.0)
        bwd = pltpu.roll(x, shift=s, axis=0)             # bwd[r] = x[(r - s) % R]
        shifted[-s] = jnp.where(l_idx >= s, bwd, 0.0)

    # Depthwise dilated conv taps (VPU), then accumulate each branch through
    # its matching 64-row slice of w_1x1 (bf16 MXU matmul, f32 accumulation).
    acc = jnp.zeros((R, F), jnp.float32)
    for d in (1, 2, 3, 4):                               # conv1..conv4
        br = (shifted[-d] * wdw_ref[d - 1, 0:1, :]
              + x * wdw_ref[d - 1, 1:2, :]
              + shifted[d] * wdw_ref[d - 1, 2:3, :])     # (R, E) f32, no bias
        acc = acc + jnp.dot(br.astype(jnp.bfloat16),
                            w1_ref[(d - 1) * E:d * E, :],
                            preferred_element_type=jnp.float32)

    # conv1x1 bias (depthwise biases pre-folded in the wrapper) + ReLU
    y = jnp.maximum(acc + beff_ref[...], 0.0)            # (R, 256) f32

    # max_pool1d over the whole length; mean over the size-1 dim == identity.
    out_ref[0] = jnp.max(y.reshape(TB, L, F), axis=1)    # (TB, 256), lane-dense


# -----------------------------------------------------------------------------
# Helpers.
# -----------------------------------------------------------------------------
def _fuse_pointwise(params):
    """bf16 copy of w_1x1 and the effective bias b_1x1 + concat(b_dw) @ w_1x1."""
    w1 = params["w_1x1"]                                 # (256, 256) f32, (in, out)
    b_dw_cat = params["b_dw"].reshape(1, -1)             # (1, 256): conv1..conv4 order
    b_eff = (params["b_1x1"] + b_dw_cat @ w1).astype(jnp.float32)
    return w1.astype(jnp.bfloat16), b_eff


def _choose_batch_tile(B, L):
    """TB*L ~ 256 (fills MXU M on v6e/v7x; v5e saturates at 128) but keep >=2 steps."""
    target_rows = 256
    tb = max(1, target_rows // max(L, 1))
    tb = min(tb, B)
    if B >= 2 and pl.cdiv(B, tb) < 2:     # keep >=2 parallel steps for v7x megacore
        tb = pl.cdiv(B, 2)
    return tb


# -----------------------------------------------------------------------------
# Wrapper: embedding lookup (with max_norm) + tiny fc in JAX, rest in the kernel.
# -----------------------------------------------------------------------------
def sentence_cnn_forward(input_ids, params):
    emb_table = params["embedding"]                      # (V, E)
    x = emb_table[input_ids].astype(jnp.float32)         # (B, L, E) gather
    # nn.Embedding(max_norm=5.0): rows with L2 norm > 5 are rescaled to norm 5.
    # TODO(synk): PyTorch also writes the renormalized rows back into the weight
    # (in-place side effect); only the functional lookup semantics are reproduced.
    norms = jnp.sqrt(jnp.sum(x * x, axis=-1, keepdims=True))
    x = x * jnp.minimum(1.0, 5.0 / jnp.maximum(norms, 1e-7))

    B, L, E = x.shape
    F = 4 * E                                            # 256 concatenated channels
    w1_bf16, b_eff = _fuse_pointwise(params)

    TB = _choose_batch_tile(B, L)
    n_blocks = pl.cdiv(B, TB)
    B_pad = n_blocks * TB
    if B_pad != B:
        x = jnp.pad(x, ((0, B_pad - B), (0, 0), (0, 0)))

    pooled = pl.pallas_call(
        sentence_cnn_kernel,
        out_shape=jax.ShapeDtypeStruct((n_blocks, TB, F), jnp.float32),
        grid_spec=pltpu.PrefetchScalarGridSpec(
            num_scalar_prefetch=0,
            grid=(n_blocks,),
            in_specs=[
                pl.BlockSpec((TB, L, E), lambda b: (b, 0, 0)),   # embedded tokens
                pl.BlockSpec((4, 3, E), lambda b: (0, 0, 0)),    # depthwise conv taps
                pl.BlockSpec((F, F), lambda b: (0, 0)),          # w_1x1 (in,out) bf16
                pl.BlockSpec((1, F), lambda b: (0, 0)),          # fused 1x1 bias
            ],
            out_specs=pl.BlockSpec((1, TB, F), lambda b: (b, 0, 0)),
        ),
        compiler_params=pltpu.CompilerParams(dimension_semantics=("parallel",)),
    )(x, params["w_dw"], w1_bf16, b_eff)

    pooled = pooled.reshape(B_pad, F)[:B]                # (B, 256), drop batch padding
    # fc: Linear(256, num_classes) -- tiny, kept in XLA so the kernel output
    # stays 256-lane dense instead of a masked 8-lane store.
    return pooled @ params["w_fc"] + params["b_fc"]      # (B, C)


# -----------------------------------------------------------------------------
# Deterministic synthetic parameters (shapes implied by __init__).
# groups=64 requires embed_size % 64 == 0; we use embed_size=64 (pure depthwise).
# -----------------------------------------------------------------------------
def init_params(key, vocab_size, embed_size, num_classes):
    assert embed_size == 64, "Conv1d(groups=64) => embed_size must be 64 here"
    ks = jax.random.split(key, 7)
    emb = jax.random.normal(ks[0], (vocab_size, embed_size), jnp.float32)
    emb = emb.at[0].set(0.0)                                   # padding_idx=0
    # depthwise conv weights, layout (dilation-1, tap k, channel) == torch weight[c,0,k]
    w_dw = 0.3 * jax.random.normal(ks[1], (4, 3, embed_size), jnp.float32)
    b_dw = 0.1 * jax.random.normal(ks[2], (4, embed_size), jnp.float32)
    # conv1x1 weight stored pre-transposed as (in=256, out=256)
    w_1x1 = (1.0 / 16.0) * jax.random.normal(ks[3], (256, 256), jnp.float32)
    b_1x1 = 0.1 * jax.random.normal(ks[4], (1, 256), jnp.float32)
    # fc weight stored pre-transposed as (in=256, out=num_classes)
    w_fc = (1.0 / 16.0) * jax.random.normal(ks[5], (256, num_classes), jnp.float32)
    b_fc = 0.1 * jax.random.normal(ks[6], (1, num_classes), jnp.float32)
    return dict(embedding=emb, w_dw=w_dw, b_dw=b_dw,
                w_1x1=w_1x1, b_1x1=b_1x1, w_fc=w_fc, b_fc=b_fc)


# -----------------------------------------------------------------------------
# Pure-JAX reference (pad+slice windows, full channel concat, single matmul).
# Uses the same bf16-on-MXU precision and the same folded bias so the
# comparison is apples-to-apples; structurally it does not share the kernel's
# roll/mask, w1-slicing, batch-tiling or pooling code paths.
# -----------------------------------------------------------------------------
def reference_forward(input_ids, params):
    x = params["embedding"][input_ids].astype(jnp.float32)
    norms = jnp.sqrt(jnp.sum(x * x, axis=-1, keepdims=True))
    x = x * jnp.minimum(1.0, 5.0 / jnp.maximum(norms, 1e-7))
    B, L, E = x.shape
    branches = []
    for d in (1, 2, 3, 4):
        xp = jnp.pad(x, ((0, 0), (d, d), (0, 0)))
        acc = jnp.zeros((B, L, E), jnp.float32)
        for k in range(3):
            acc = acc + xp[:, k * d:k * d + L, :] * params["w_dw"][d - 1, k][None, None, :]
        branches.append(acc)
    cat = jnp.concatenate(branches, axis=-1)                   # (B, L, 256), biases folded
    w1_bf16, b_eff = _fuse_pointwise(params)
    y = jnp.dot(cat.reshape(B * L, 4 * E).astype(jnp.bfloat16), w1_bf16,
                preferred_element_type=jnp.float32).reshape(B, L, 4 * E)
    y = jnp.maximum(y + b_eff[None, :, :], 0.0)
    pooled = jnp.max(y, axis=1)                                # (B, 256)
    return pooled @ params["w_fc"] + params["b_fc"]


if __name__ == "__main__":
    vocab_size, embed_size, num_classes = 100, 64, 8
    key = jax.random.PRNGKey(0)
    k_par, k_ids = jax.random.split(key)
    params = init_params(k_par, vocab_size, embed_size, num_classes)

    # Case 1: small batch (TB=1, 2 parallel grid steps).
    batch, seq_len = 2, 16
    input_ids = jax.random.randint(k_ids, (batch, seq_len), 0, vocab_size, jnp.int32)
    logits = jax.block_until_ready(sentence_cnn_forward(input_ids, params))
    ref = jax.block_until_ready(reference_forward(input_ids, params))
    assert logits.shape == (batch, num_classes)
    assert jnp.allclose(logits, ref, rtol=1e-3, atol=1e-3), (logits, ref)

    # Case 2: larger batch exercising TB>1 batch tiling + batch padding.
    batch2 = 13
    ids2 = jax.random.randint(jax.random.PRNGKey(1), (batch2, seq_len), 0,
                              vocab_size, jnp.int32)
    logits2 = jax.block_until_ready(sentence_cnn_forward(ids2, params))
    ref2 = jax.block_until_ready(reference_forward(ids2, params))
    assert logits2.shape == (batch2, num_classes)
    assert jnp.allclose(logits2, ref2, rtol=1e-3, atol=1e-3), (logits2, ref2)

    print("KERNEL_OK")
</pallas_src>

<mosaic_0001>
module attributes {stable_mosaic.version = 11 : i64} {
  func.func @sentence_cnn_kernel(%arg0: i32, %arg1: memref<1x16x64xf32, #tpu.memory_space<vmem>>, %arg2: memref<4x3x64xf32, #tpu.memory_space<vmem>>, %arg3: memref<256x256xbf16, #tpu.memory_space<vmem>>, %arg4: memref<1x256xf32, #tpu.memory_space<vmem>>, %arg5: memref<1x1x256xf32, #tpu.memory_space<vmem>>) attributes {dimension_semantics = [#tpu.dimension_semantics<parallel>], iteration_bounds = array<i64: 2>, scalar_prefetch = 0 : i64, scratch_operands = 0 : i64, tpu.core_type = #tpu.core_type<tc>, window_params = [{transform_indices = @transform_0, window_bounds = array<i64: 1, 16, 64>}, {pipeline_mode = #tpu.pipeline_mode<synchronous>, transform_indices = @transform_1, window_bounds = array<i64: 4, 3, 64>}, {pipeline_mode = #tpu.pipeline_mode<synchronous>, transform_indices = @transform_2, window_bounds = array<i64: 256, 256>}, {pipeline_mode = #tpu.pipeline_mode<synchronous>, transform_indices = @transform_3, window_bounds = array<i64: 1, 256>}, {transform_indices = @transform_4, window_bounds = array<i64: 1, 1, 256>}]} {
    %c0 = arith.constant 0 : index
    %c0_0 = arith.constant 0 : index
    %c0_1 = arith.constant 0 : index
    %0 = vector.load %arg1[%c0, %c0_0, %c0_1] : memref<1x16x64xf32, #tpu.memory_space<vmem>>, vector<1x16x64xf32>
    %1 = vector.shape_cast %0 : vector<1x16x64xf32> to vector<16x64xf32>
    %2 = tpu.iota {dimensions = array<i32: 1>} : vector<1x16x64xi32>
    %3 = vector.shape_cast %2 : vector<1x16x64xi32> to vector<16x64xi32>
    %c15_i32 = arith.constant 15 : i32
    %4 = tpu.dynamic_rotate %1 by %c15_i32 dim 0 : vector<16x64xf32>, i32 -> vector<16x64xf32>
    %c15_i32_2 = arith.constant 15 : i32
    %5 = vector.broadcast %c15_i32_2 : i32 to vector<16x64xi32>
    %6 = arith.cmpi slt, %3, %5 : vector<16x64xi32>
    %cst = arith.constant 0.000000e+00 : f32
    %7 = vector.broadcast %cst : f32 to vector<16x64xf32>
    %8 = arith.select %6, %4, %7 : vector<16x64xi1>, vector<16x64xf32>
    %c1_i32 = arith.constant 1 : i32
    %9 = tpu.dynamic_rotate %1 by %c1_i32 dim 0 : vector<16x64xf32>, i32 -> vector<16x64xf32>
    %c1_i32_3 = arith.constant 1 : i32
    %10 = vector.broadcast %c1_i32_3 : i32 to vector<16x64xi32>
    %11 = arith.cmpi sge, %3, %10 : vector<16x64xi32>
    %cst_4 = arith.constant 0.000000e+00 : f32
    %12 = vector.broadcast %cst_4 : f32 to vector<16x64xf32>
    %13 = arith.select %11, %9, %12 : vector<16x64xi1>, vector<16x64xf32>
    %c14_i32 = arith.constant 14 : i32
    %14 = tpu.dynamic_rotate %1 by %c14_i32 dim 0 : vector<16x64xf32>, i32 -> vector<16x64xf32>
    %c14_i32_5 = arith.constant 14 : i32
    %15 = vector.broadcast %c14_i32_5 : i32 to vector<16x64xi32>
    %16 = arith.cmpi slt, %3, %15 : vector<16x64xi32>
    %cst_6 = arith.constant 0.000000e+00 : f32
    %17 = vector.broadcast %cst_6 : f32 to vector<16x64xf32>
    %18 = arith.select %16, %14, %17 : vector<16x64xi1>, vector<16x64xf32>
    %c2_i32 = arith.constant 2 : i32
    %19 = tpu.dynamic_rotate %1 by %c2_i32 dim 0 : vector<16x64xf32>, i32 -> vector<16x64xf32>
    %c2_i32_7 = arith.constant 2 : i32
    %20 = vector.broadcast %c2_i32_7 : i32 to vector<16x64xi32>
    %21 = arith.cmpi sge, %3, %20 : vector<16x64xi32>
    %cst_8 = arith.constant 0.000000e+00 : f32
    %22 = vector.broadcast %cst_8 : f32 to vector<16x64xf32>
    %23 = arith.select %21, %19, %22 : vector<16x64xi1>, vector<16x64xf32>
    %c13_i32 = arith.constant 13 : i32
    %24 = tpu.dynamic_rotate %1 by %c13_i32 dim 0 : vector<16x64xf32>, i32 -> vector<16x64xf32>
    %c13_i32_9 = arith.constant 13 : i32
    %25 = vector.broadcast %c13_i32_9 : i32 to vector<16x64xi32>
    %26 = arith.cmpi slt, %3, %25 : vector<16x64xi32>
    %cst_10 = arith.constant 0.000000e+00 : f32
    %27 = vector.broadcast %cst_10 : f32 to vector<16x64xf32>
    %28 = arith.select %26, %24, %27 : vector<16x64xi1>, vector<16x64xf32>
    %c3_i32 = arith.constant 3 : i32
    %29 = tpu.dynamic_rotate %1 by %c3_i32 dim 0 : vector<16x64xf32>, i32 -> vector<16x64xf32>
    %c3_i32_11 = arith.constant 3 : i32
    %30 = vector.broadcast %c3_i32_11 : i32 to vector<16x64xi32>
    %31 = arith.cmpi sge, %3, %30 : vector<16x64xi32>
    %cst_12 = arith.constant 0.000000e+00 : f32
    %32 = vector.broadcast %cst_12 : f32 to vector<16x64xf32>
    %33 = arith.select %31, %29, %32 : vector<16x64xi1>, vector<16x64xf32>
    %c12_i32 = arith.constant 12 : i32
    %34 = tpu.dynamic_rotate %1 by %c12_i32 dim 0 : vector<16x64xf32>, i32 -> vector<16x64xf32>
    %c12_i32_13 = arith.constant 12 : i32
    %35 = vector.broadcast %c12_i32_13 : i32 to vector<16x64xi32>
    %36 = arith.cmpi slt, %3, %35 : vector<16x64xi32>
    %cst_14 = arith.constant 0.000000e+00 : f32
    %37 = vector.broadcast %cst_14 : f32 to vector<16x64xf32>
    %38 = arith.select %36, %34, %37 : vector<16x64xi1>, vector<16x64xf32>
    %c4_i32 = arith.constant 4 : i32
    %39 = tpu.dynamic_rotate %1 by %c4_i32 dim 0 : vector<16x64xf32>, i32 -> vector<16x64xf32>
    %c4_i32_15 = arith.constant 4 : i32
    %40 = vector.broadcast %c4_i32_15 : i32 to vector<16x64xi32>
    %41 = arith.cmpi sge, %3, %40 : vector<16x64xi32>
    %cst_16 = arith.constant 0.000000e+00 : f32
    %42 = vector.broadcast %cst_16 : f32 to vector<16x64xf32>
    %43 = arith.select %41, %39, %42 : vector<16x64xi1>, vector<16x64xf32>
    %cst_17 = arith.constant 0.000000e+00 : f32
    %44 = vector.broadcast %cst_17 : f32 to vector<16x256xf32>
    %c0_18 = arith.constant 0 : index
    %c0_19 = arith.constant 0 : index
    %c0_20 = arith.constant 0 : index
    %45 = vector.load %arg2[%c0_18, %c0_19, %c0_20] : memref<4x3x64xf32, #tpu.memory_space<vmem>>, vector<1x1x64xf32>
    %46 = vector.shape_cast %45 : vector<1x1x64xf32> to vector<1x64xf32>
    %47 = vector.broadcast %46 : vector<1x64xf32> to vector<16x64xf32>
    %48 = arith.mulf %13, %47 : vector<16x64xf32>
    %c0_21 = arith.constant 0 : index
    %c1 = arith.constant 1 : index
    %c0_22 = arith.constant 0 : index
    %49 = vector.load %arg2[%c0_21, %c1, %c0_22] : memref<4x3x64xf32, #tpu.memory_space<vmem>>, vector<1x1x64xf32>
    %50 = vector.shape_cast %49 : vector<1x1x64xf32> to vector<1x64xf32>
    %51 = vector.broadcast %50 : vector<1x64xf32> to vector<16x64xf32>
    %52 = arith.mulf %1, %51 : vector<16x64xf32>
    %53 = arith.addf %48, %52 : vector<16x64xf32>
    %c0_23 = arith.constant 0 : index
    %c2 = arith.constant 2 : index
    %c0_24 = arith.constant 0 : index
    %54 = vector.load %arg2[%c0_23, %c2, %c0_24] : memref<4x3x64xf32, #tpu.memory_space<vmem>>, vector<1x1x64xf32>
    %55 = vector.shape_cast %54 : vector<1x1x64xf32> to vector<1x64xf32>
    %56 = vector.broadcast %55 : vector<1x64xf32> to vector<16x64xf32>
    %57 = arith.mulf %8, %56 : vector<16x64xf32>
    %58 = arith.addf %53, %57 : vector<16x64xf32>
    %59 = arith.truncf %58 : vector<16x64xf32> to vector<16x64xbf16>
    %c0_25 = arith.constant 0 : index
    %c0_26 = arith.constant 0 : index
    %60 = vector.load %arg3[%c0_25, %c0_26] : memref<256x256xbf16, #tpu.memory_space<vmem>>, vector<64x256xbf16>
    %cst_27 = arith.constant dense<0.000000e+00> : vector<16x256xf32>
    %61 = tpu.matmul %59, %60, %cst_27 {dimension_numbers = #tpu.dot_dimension_numbers<[1], [0], [0], [1], [0, 0, 1, 1], [], []>} : vector<16x64xbf16>, vector<64x256xbf16>, vector<16x256xf32> -> vector<16x256xf32>
    %62 = arith.addf %44, %61 : vector<16x256xf32>
    %c1_28 = arith.constant 1 : index
    %c0_29 = arith.constant 0 : index
    %c0_30 = arith.constant 0 : index
    %63 = vector.load %arg2[%c1_28, %c0_29, %c0_30] : memref<4x3x64xf32, #tpu.memory_space<vmem>>, vector<1x1x64xf32>
    %64 = vector.shape_cast %63 : vector<1x1x64xf32> to vector<1x64xf32>
    %65 = vector.broadcast %64 : vector<1x64xf32> to vector<16x64xf32>
    %66 = arith.mulf %23, %65 : vector<16x64xf32>
    %c1_31 = arith.constant 1 : index
    %c1_32 = arith.constant 1 : index
    %c0_33 = arith.constant 0 : index
    %67 = vector.load %arg2[%c1_31, %c1_32, %c0_33] : memref<4x3x64xf32, #tpu.memory_space<vmem>>, vector<1x1x64xf32>
    %68 = vector.shape_cast %67 : vector<1x1x64xf32> to vector<1x64xf32>
    %69 = vector.broadcast %68 : vector<1x64xf32> to vector<16x64xf32>
    %70 = arith.mulf %1, %69 : vector<16x64xf32>
    %71 = arith.addf %66, %70 : vector<16x64xf32>
    %c1_34 = arith.constant 1 : index
    %c2_35 = arith.constant 2 : index
    %c0_36 = arith.constant 0 : index
    %72 = vector.load %arg2[%c1_34, %c2_35, %c0_36] : memref<4x3x64xf32, #tpu.memory_space<vmem>>, vector<1x1x64xf32>
    %73 = vector.shape_cast %72 : vector<1x1x64xf32> to vector<1x64xf32>
    %74 = vector.broadcast %73 : vector<1x64xf32> to vector<16x64xf32>
    %75 = arith.mulf %18, %74 : vector<16x64xf32>
    %76 = arith.addf %71, %75 : vector<16x64xf32>
    %77 = arith.truncf %76 : vector<16x64xf32> to vector<16x64xbf16>
    %c64 = arith.constant 64 : index
    %c0_37 = arith.constant 0 : index
    %78 = vector.load %arg3[%c64, %c0_37] : memref<256x256xbf16, #tpu.memory_space<vmem>>, vector<64x256xbf16>
    %cst_38 = arith.constant dense<0.000000e+00> : vector<16x256xf32>
    %79 = tpu.matmul %77, %78, %cst_38 {dimension_numbers = #tpu.dot_dimension_numbers<[1], [0], [0], [1], [0, 0, 1, 1], [], []>} : vector<16x64xbf16>, vector<64x256xbf16>, vector<16x256xf32> -> vector<16x256xf32>
    %80 = arith.addf %62, %79 : vector<16x256xf32>
    %c2_39 = arith.constant 2 : index
    %c0_40 = arith.constant 0 : index
    %c0_41 = arith.constant 0 : index
    %81 = vector.load %arg2[%c2_39, %c0_40, %c0_41] : memref<4x3x64xf32, #tpu.memory_space<vmem>>, vector<1x1x64xf32>
    %82 = vector.shape_cast %81 : vector<1x1x64xf32> to vector<1x64xf32>
    %83 = vector.broadcast %82 : vector<1x64xf32> to vector<16x64xf32>
    %84 = arith.mulf %33, %83 : vector<16x64xf32>
    %c2_42 = arith.constant 2 : index
    %c1_43 = arith.constant 1 : index
    %c0_44 = arith.constant 0 : index
    %85 = vector.load %arg2[%c2_42, %c1_43, %c0_44] : memref<4x3x64xf32, #tpu.memory_space<vmem>>, vector<1x1x64xf32>
    %86 = vector.shape_cast %85 : vector<1x1x64xf32> to vector<1x64xf32>
    %87 = vector.broadcast %86 : vector<1x64xf32> to vector<16x64xf32>
    %88 = arith.mulf %1, %87 : vector<16x64xf32>
    %89 = arith.addf %84, %88 : vector<16x64xf32>
    %c2_45 = arith.constant 2 : index
    %c2_46 = arith.constant 2 : index
    %c0_47 = arith.constant 0 : index
    %90 = vector.load %arg2[%c2_45, %c2_46, %c0_47] : memref<4x3x64xf32, #tpu.memory_space<vmem>>, vector<1x1x64xf32>
    %91 = vector.shape_cast %90 : vector<1x1x64xf32> to vector<1x64xf32>
    %92 = vector.broadcast %91 : vector<1x64xf32> to vector<16x64xf32>
    %93 = arith.mulf %28, %92 : vector<16x64xf32>
    %94 = arith.addf %89, %93 : vector<16x64xf32>
    %95 = arith.truncf %94 : vector<16x64xf32> to vector<16x64xbf16>
    %c128 = arith.constant 128 : index
    %c0_48 = arith.constant 0 : index
    %96 = vector.load %arg3[%c128, %c0_48] : memref<256x256xbf16, #tpu.memory_space<vmem>>, vector<64x256xbf16>
    %cst_49 = arith.constant dense<0.000000e+00> : vector<16x256xf32>
    %97 = tpu.matmul %95, %96, %cst_49 {dimension_numbers = #tpu.dot_dimension_numbers<[1], [0], [0], [1], [0, 0, 1, 1], [], []>} : vector<16x64xbf16>, vector<64x256xbf16>, vector<16x256xf32> -> vector<16x256xf32>
    %98 = arith.addf %80, %97 : vector<16x256xf32>
    %c3 = arith.constant 3 : index
    %c0_50 = arith.constant 0 : index
    %c0_51 = arith.constant 0 : index
    %99 = vector.load %arg2[%c3, %c0_50, %c0_51] : memref<4x3x64xf32, #tpu.memory_space<vmem>>, vector<1x1x64xf32>
    %100 = vector.shape_cast %99 : vector<1x1x64xf32> to vector<1x64xf32>
    %101 = vector.broadcast %100 : vector<1x64xf32> to vector<16x64xf32>
    %102 = arith.mulf %43, %101 : vector<16x64xf32>
    %c3_52 = arith.constant 3 : index
    %c1_53 = arith.constant 1 : index
    %c0_54 = arith.constant 0 : index
    %103 = vector.load %arg2[%c3_52, %c1_53, %c0_54] : memref<4x3x64xf32, #tpu.memory_space<vmem>>, vector<1x1x64xf32>
    %104 = vector.shape_cast %103 : vector<1x1x64xf32> to vector<1x64xf32>
    %105 = vector.broadcast %104 : vector<1x64xf32> to vector<16x64xf32>
    %106 = arith.mulf %1, %105 : vector<16x64xf32>
    %107 = arith.addf %102, %106 : vector<16x64xf32>
    %c3_55 = arith.constant 3 : index
    %c2_56 = arith.constant 2 : index
    %c0_57 = arith.constant 0 : index
    %108 = vector.load %arg2[%c3_55, %c2_56, %c0_57] : memref<4x3x64xf32, #tpu.memory_space<vmem>>, vector<1x1x64xf32>
    %109 = vector.shape_cast %108 : vector<1x1x64xf32> to vector<1x64xf32>
    %110 = vector.broadcast %109 : vector<1x64xf32> to vector<16x64xf32>
    %111 = arith.mulf %38, %110 : vector<16x64xf32>
    %112 = arith.addf %107, %111 : vector<16x64xf32>
    %113 = arith.truncf %112 : vector<16x64xf32> to vector<16x64xbf16>
    %c192 = arith.constant 192 : index
    %c0_58 = arith.constant 0 : index
    %114 = vector.load %arg3[%c192, %c0_58] : memref<256x256xbf16, #tpu.memory_space<vmem>>, vector<64x256xbf16>
    %cst_59 = arith.constant dense<0.000000e+00> : vector<16x256xf32>
    %115 = tpu.matmul %113, %114, %cst_59 {dimension_numbers = #tpu.dot_dimension_numbers<[1], [0], [0], [1], [0, 0, 1, 1], [], []>} : vector<16x64xbf16>, vector<64x256xbf16>, vector<16x256xf32> -> vector<16x256xf32>
    %116 = arith.addf %98, %115 : vector<16x256xf32>
    %c0_60 = arith.constant 0 : index
    %c0_61 = arith.constant 0 : index
    %117 = vector.load %arg4[%c0_60, %c0_61] : memref<1x256xf32, #tpu.memory_space<vmem>>, vector<1x256xf32>
    %118 = vector.broadcast %117 : vector<1x256xf32> to vector<16x256xf32>
    %119 = arith.addf %116, %118 : vector<16x256xf32>
    %cst_62 = arith.constant 0.000000e+00 : f32
    %120 = vector.broadcast %cst_62 : f32 to vector<16x256xf32>
    %121 = arith.maximumf %119, %120 : vector<16x256xf32>
    %122 = vector.shape_cast %121 : vector<16x256xf32> to vector<1x16x256xf32>
    %cst_63 = arith.constant dense<0xFF800000> : vector<1x256xf32>
    %123 = vector.multi_reduction <maximumf>, %122, %cst_63 [1] : vector<1x16x256xf32> to vector<1x256xf32>
    %c0_64 = arith.constant 0 : index
    %c0_65 = arith.constant 0 : index
    %c0_66 = arith.constant 0 : index
    %124 = vector.load %arg5[%c0_64, %c0_65, %c0_66] : memref<1x1x256xf32, #tpu.memory_space<vmem>>, vector<1x1x256xf32>
    %125 = vector.shape_cast %124 : vector<1x1x256xf32> to vector<1x256xf32>
    %126 = vector.shape_cast %123 : vector<1x256xf32> to vector<1x1x256xf32>
    tpu.vector_store %arg5[%c0_64, %c0_65, %c0_66], %126 {strides = array<i32>} : memref<1x1x256xf32, #tpu.memory_space<vmem>>, vector<1x1x256xf32>,
    return
  }
  func.func @transform_0(%arg0: i32) -> (i32, i32, i32) {
    %c0_i32 = arith.constant 0 : i32
    %c0_i32_0 = arith.constant 0 : i32
    %c0_i32_1 = arith.constant 0 : i32
    return %arg0, %c0_i32, %c0_i32_0 : i32, i32, i32
  }
  func.func @transform_1(%arg0: i32) -> (i32, i32, i32) {
    %c0_i32 = arith.constant 0 : i32
    %c0_i32_0 = arith.constant 0 : i32
    %c0_i32_1 = arith.constant 0 : i32
    %c0_i32_2 = arith.constant 0 : i32
    return %c0_i32, %c0_i32_0, %c0_i32_1 : i32, i32, i32
  }
  func.func @transform_2(%arg0: i32) -> (i32, i32) {
    %c0_i32 = arith.constant 0 : i32
    %c0_i32_0 = arith.constant 0 : i32
    %c0_i32_1 = arith.constant 0 : i32
    return %c0_i32, %c0_i32_0 : i32, i32
  }
  func.func @transform_3(%arg0: i32) -> (i32, i32) {
    %c0_i32 = arith.constant 0 : i32
    %c0_i32_0 = arith.constant 0 : i32
    %c0_i32_1 = arith.constant 0 : i32
    return %c0_i32, %c0_i32_0 : i32, i32
  }
  func.func @transform_4(%arg0: i32) -> (i32, i32, i32) {
    %c0_i32 = arith.constant 0 : i32
    %c0_i32_0 = arith.constant 0 : i32
    %c0_i32_1 = arith.constant 0 : i32
    return %arg0, %c0_i32, %c0_i32_0 : i32, i32, i32
  }
}

</mosaic_0001>

<bundles_post_ra>
// kernel: tpu_custom_call.1
= control target key start
LH: loop header
LB: loop body
LE: loop exit
PB: predicated region body
PF: predicated region fallthrough
CT: control target
= control target key end

     0   :  { %9 = vsyncpa [#allocation3], 0  ;;  %s1658_s0 = inlined_call_operand.hbm [shape: f32[2,16,64], index: 0, kind: input, shape index: {}]   ;;  %s1659_s1 = inlined_call_operand.vmem [shape: f32[4,3,64], index: 1, kind: input, shape index: {}]   ;;  %s1660_s2 = inlined_call_operand.hbm [shape: bf16[256,256], index: 2, kind: input, shape index: {}]   ;;  %s1661_s3 = inlined_call_operand.vmem [shape: f32[1,256], index: 3, kind: input, shape index: {}]   ;;  %s1662_s4 = inlined_call_operand.hbm [shape: f32[2,1,256], index: 4, kind: output, shape index: {}]  }
   0x1   :  { %11 = vsyncpa [#allocation3 + $0x1], 0 }
   0x2   :  { %12 = vsyncpa [#allocation6], 0 }
   0x3   :  { %13 = vsyncpa [#allocation4], 0 }
   0x4   :  { %15 = vsyncpa [#allocation4 + $0x1], 0  ;;  %s1306_s15 = smov 0   ;;  %s1308_s16 = smov 0  }
   0x5   :  { %s1310_s17 = smov 0   ;;  %s1312_s18 = smov 0  }
   0x6 LB: > { %s1327_s19 = sadd.s32 4294967295, %s1272_s18   ;;  %s948_s20 = sadd.s32 4294967294, %s1272_s18   ;;  %s1272_s18 = sphi %s1312_s18, %s1682_s18   ;;  %s1268_s17 = sphi %s1310_s17, %s1681_s17   ;;  %s1264_s16 = sphi %s1308_s16, %s1680_s16   ;;  %s1260_s15 = sphi %s1306_s15, %s1679_s15  }
   0x7   : > { %p41_p0 = scmp.ne.s32.totalorder %s1264_s16, %s1260_s15  ;;  %p1663_p1 = scmp.eq.s32.totalorder %s1327_s19, 0 }
   0x8   : > { %p134_p3 = scmp.eq.s32.totalorder %s948_s20, 1  ;;  %p949_p5 = scmp.ge.s32.totalorder %s1272_s18, 1 }
   0x9   : > { %p1336_p4 = por %p1663_p1, %p41_p0  ;;  %p141_p7 = scmp.lt.s32.totalorder %s1272_s18, 3 }
   0xa   : > { %p1341_p6 = por %p134_p3, %p41_p0  ;;  %s1274_s24 = smov [#allocation5]  }
   0xb   : > { %s1666_s21 = scalar_select %p1336_p4, 1, 0 }
   0xc   : > { %s1667_s22 = scalar_select %p1341_p6, 1, 0 }
   0xd   : > { %p1346_p8 = pnand %p949_p5, %p141_p7  ;;  %s156_s25 = sshll.u32 %s1274_s24, 4  ;;  %s1350_s25 = int_to_ptr.vmem [resolvable:$true] %s156_s25 }
   0xe   : > { %s1362_s27 = sadd.s32 1, %s1272_s18   ;;  %s28_s28 = sadd.s32 1, %s1268_s17 }
   0xf   : > { %s1668_s23 = scalar_select %p1346_p8, 1, 0 }
  0x10   : > { %p1043_p9 = pneg %p1346_p8  ;;  %s25_s29 = ssub.s32 %s1272_s18, %s1362_s27 }
  0x11   : > { %s1144_s6 = scalar_lea.hbm %s1660_s2, 4096 }
  0x12   : > { %p1357_p11 = pnand %p1043_p9, %p1663_p1  ;;  %p1145_p12 = scmp.ne.s32.totalorder %s1660_s2, %s1144_s6 }
  0x13   : > { %p1151_p5 = scmp.lt.u32.totalorder %s1144_s6, %s1660_s2 }
  0x14   : > { %p1146_p13 = pneg %p1357_p11 }
  0x16   : > { %p1147_p0 = pnand %p1146_p13, %p1145_p12 }
  0x18   : > { %p1148_p3 = pneg %p1147_p0 }
  0x1a   : > { %p1153_p7 = pnand %p1151_p5, %p1148_p3 }
  0x1c   : > { %1156 = shalt.err (!%p1153_p7)
}
  0x1d   : > { %s1157_s11 = scalar_lea.vmem %s1350_s25, 4096  ;;  %p1165_p2 = scmp.lt.s32.totalorder %s1350_s25, %s1350_s25 }
  0x1e   : > { %p1158_p9 = scmp.ne.s32.totalorder %s1350_s25, %s1157_s11  ;;  %p1166_p6 = scmp.lt.s32.totalorder %s1157_s11, %s1157_s11 }
  0x20   : > { %p1160_p10 = pnand %p1158_p9, %p1146_p13  ;;  %p1167_p4 = por %p1166_p6, %p1165_p2 }
  0x22   : > { %p1161_p1 = pneg %p1160_p10 }
  0x24   : > { %p1168_p8 = pnand %p1167_p4, %p1161_p1 }
  0x26   : > { %1171 = shalt.err (!%p1168_p8)
}
  0x27   : > { %s1275_s12 = smov 128   ;;  %s1276_s13 = smov 8  }
  0x28   : > { %1046 = dma.hbm_to_vmem [thread:$0]  (!%p1357_p11), %s1660_s2, 4096, %s1350_s25, [#allocation6], %s1275_s12, %s1275_s12, %s1276_s13  }
  0x29   : > { %p26_p1 = scmp.eq.s32.totalorder %s25_s29, 0  ;;  %p35_p2 = scmp.ne.s32.totalorder %s1268_s17, %s1264_s16 }
  0x2a   : > { %p36_p4 = scmp.eq.s32.totalorder %s1272_s18, 0  ;;  %p1056_p6 = scmp.lt.s32.totalorder %s1272_s18, 2 }
  0x2b   : > { %s1396_s24 = scalar_select %p26_p1, %s1268_s17, %s28_s28  }
  0x2c   : > { %p37_p8 = por %p36_p4, %p35_p2  ;;  %p1670_p10 = scmp.eq.s32.totalorder %s1327_s19, 1 }
  0x2d   : > { %s173_s26 = sand.u32 1, %s1268_s17   ;;  %s1021_s5 = sshll.u32 %s1272_s18, 8 }
  0x2e   : > { %p1400_p12 = por %p1670_p10, %p35_p2  ;;  %s952_s6 = sshll.u32 %s173_s26, 4 }
  0x2f   : > { %s1409_s9 = scalar_lea.hbm %s1658_s0, %s1021_s5  ;;  %s177_s25 = scalar_lea.vmem [#allocation2], %s952_s6 }
  0x30   : > { %s184_s28 = sshll.u32 %s177_s25, 4  ;;  %p1411_p11 = pnand %p1056_p6, %p37_p8  ;;  %s1415_s28 = int_to_ptr.vmem [resolvable:$true] %s184_s28 }
  0x31   : > { %s1417_s10 = scalar_lea.sflag [#allocation3], %s173_s26  ;;  %s1172_s11 = scalar_lea.hbm %s1409_s9, 256 }
  0x32   : > { %p1173_p13 = scmp.ne.s32.totalorder %s1409_s9, %s1172_s11  ;;  %p1174_p0 = pneg %p1411_p11 }
  0x33   : > { %s1177_s5 = scalar_lea.hbm %s1658_s0, 512  ;;  %p1178_p7 = scmp.lt.u32.totalorder %s1409_s9, %s1658_s0 }
  0x34   : > { %p1175_p3 = pnand %p1174_p0, %p1173_p13  ;;  %p1179_p9 = scmp.lt.u32.totalorder %s1177_s5, %s1172_s11 }
  0x35   : > { %p1181_p2 = scmp.lt.u32.totalorder %s1172_s11, %s1409_s9 }
  0x36   : > { %p1176_p5 = pneg %p1175_p3  ;;  %p1180_p1 = por %p1179_p9, %p1178_p7 }
  0x38   : > { %p1182_p4 = por %p1181_p2, %p1180_p1 }
  0x3a   : > { %p1183_p6 = pnand %p1182_p4, %p1176_p5 }
  0x3c   : > { %1186 = shalt.err (!%p1183_p6)
}
  0x3d   : > { %s1187_s26 = scalar_lea.vmem %s1415_s28, 256  ;;  %s1277_s8 = smov [#allocation2]  }
  0x3e   : > { %p1188_p8 = scmp.ne.s32.totalorder %s1415_s28, %s1187_s26  ;;  %s1192_s25 = sshll.u32 %s1277_s8, 4  ;;  %s1193_s25 = int_to_ptr.vmem [resolvable:$false] %s1192_s25 }
  0x3f   : > { %s1194_s14 = scalar_lea.vmem %s1193_s25, 512  ;;  %p1195_p3 = scmp.lt.s32.totalorder %s1415_s28, %s1193_s25 }
  0x40   : > { %p1190_p10 = pnand %p1188_p8, %p1174_p0  ;;  %p1196_p7 = scmp.lt.s32.totalorder %s1194_s14, %s1187_s26 }
  0x42   : > { %p1191_p13 = pneg %p1190_p10  ;;  %p1197_p9 = por %p1196_p7, %p1195_p3 }
  0x44   : > { %p1198_p1 = pnand %p1197_p9, %p1191_p13 }
  0x46   : > { %1201 = shalt.err (!%p1198_p1)
}
  0x47   : > { %1050 = dma.hbm_to_vmem [thread:$0]  (!%p1411_p11), %s1409_s9, 256, %s1415_s28, %s1417_s10, %s1275_s12, %s1275_s12, %s1276_s13  }
  0x48   : > { %p1673_p0 = scmp.ne.s32.totalorder %s1668_s23, 0 }
  0x49   : > { %s1451_s11 = sand.u32 (!%p1673_p0), 1, %s1264_s16   ;;  %p1674_p5 = scmp.ne.s32.totalorder (!%p1673_p0), %s1666_s21, 0 }
  0x4a   : > { %196 = sbr.rel (%p1673_p0) target bundleno = 383 (0x17f), region = 36  ;;  %s956_s20 = sshll.u32 (!%p1673_p0), %s1451_s11, 4 }
  0x4b   : > { %s199_s5 = scalar_lea.sflag (!%p1673_p0), [#allocation3], %s1451_s11  ;;  %s1455_s6 = scalar_lea.vmem (!%p1673_p0), [#allocation2], %s956_s20 }
  0x51   : > { %1247 = dma.done.wait (%p1674_p5), %s199_s5, 256  }
  0x52   : > { %1249 = vsyncadd (%p1674_p5), %s199_s5, 4294967040  ;;  %p1675_p11 = scmp.eq.s32.totalorder %s1327_s19, 0 }
  0x54   : > { %1251 = dma.done.wait (%p1675_p11), [#allocation6], 4096   ;;  %p1676_p2 = pmov %p1675_p11 }
  0x55   : > { %v1278_v0 = vmov 0   ;;  %v1096_v1 = vld [vmem:[#allocation5 + $0x44] ss:$8 sps:$4 sm:$0xff]   ;;  %v234_v3 = vlaneseq  ;;  %v1100_v4 = vld [vmem:[#allocation5 + $0x40] ss:$8 sps:$4 sm:$0xff]   ;;  %vm413_vm9 = vcmask 523264  }
  0x56   : > { %1253 = vsyncadd (%p1676_p2), [#allocation6], 4294963200  ;;  %449 = vmatprep.mubr.bf16.mxu1 %v1278_v0  ;;  %656 = vmatprep.mubr.bf16.mxu0 %v1278_v0  ;;  %v1098_v2 = vld [vmem:[#allocation5 + $0x84] ss:$8 sps:$4 sm:$0xff]   ;;  %v1101_v5 = vld [vmem:[#allocation5 + $0x80] ss:$8 sps:$4 sm:$0xff]  }
  0x57   : > { %417 = vmatprep.subr.bf16.mxu1 %v1096_v1  ;;  %624 = vmatprep.subr.bf16.mxu0 %v1098_v2  ;;  %v1102_v6 = vld [vmem:[#allocation5 + $0x54] ss:$8 sps:$4 sm:$0xff]   ;;  %v1106_v8 = vld [vmem:[#allocation5 + $0x50] ss:$8 sps:$4 sm:$0xff]   ;;  %v1468_v10 = vshrl.u32 %v234_v3, 7  ;;  %s958_s8 = sshll.u32 %s1451_s11, 1 }
  0x58   : > { %418 = vmatpush1.bf16.msra.mxu1 %v1100_v4  ;;  %625 = vmatpush1.bf16.msra.mxu0 %v1101_v5  ;;  %v1104_v7 = vld [vmem:[#allocation5 + $0x94] ss:$8 sps:$4 sm:$0xff]   ;;  %v1107_v9 = vld [vmem:[#allocation5 + $0x90] ss:$8 sps:$4 sm:$0xff]   ;;  %v1108_v11 = vld [vmem:[#allocation5 + $0x64] ss:$8 sps:$4 sm:$0xff]  }
  0x59   : > { %419 = vmatprep.subr.bf16.mxu1 %v1102_v6  ;;  %626 = vmatprep.subr.bf16.mxu0 %v1104_v7  ;;  %v1110_v12 = vld [vmem:[#allocation5 + $0xa4] ss:$8 sps:$4 sm:$0xff]   ;;  %v1112_v13 = vld [vmem:[#allocation5 + $0x60] ss:$8 sps:$4 sm:$0xff]   ;;  %v1114_v15 = vld [vmem:[#allocation5 + $0x74] ss:$8 sps:$4 sm:$0xff]  }
  0x5a   : > { %v1113_v14 = vld [vmem:[#allocation5 + $0xa0] ss:$8 sps:$4 sm:$0xff]   ;;  %v1116_v16 = vld [vmem:[#allocation5 + $0xb4] ss:$8 sps:$4 sm:$0xff]   ;;  %v1471_v17 = vadd.s32 8, %v1468_v10  ;;  %vm257_vm0 = vcmp.lt.s32.totalorder %v1468_v10, 6 }
  0x5b   : > { %vm266_vm1 = vcmp.lt.s32.totalorder %v1468_v10, 2  ;;  %vm269_vm2 = vcmp.ge.s32.totalorder %v1468_v10, 2  ;;  %v1118_v18 = vld [vmem:[#allocation5 + $0x70] ss:$8 sps:$4 sm:$0xff]   ;;  %vm275_vm3 = vcmp.lt.s32.totalorder %v1468_v10, 5  ;;  %vm284_vm4 = vcmp.lt.s32.totalorder %v1468_v10, 3 }
  0x5c   : > { %420 = vmatpush1.bf16.msra.mxu1 %v1106_v8  ;;  %627 = vmatpush1.bf16.msra.mxu0 %v1107_v9  ;;  %v1119_v19 = vld [vmem:[#allocation5 + $0xb0] ss:$8 sps:$4 sm:$0xff]   ;;  %v1122_v20 = vld [vmem:[#allocation5 + $0x4] ss:$8 sps:$4 sm:$0xff]   ;;  %vm287_vm5 = vcmp.ge.s32.totalorder %v1468_v10, 3  ;;  %vm261_vm6 = vcmp.lt.s32.totalorder %v1471_v17, 14 }
  0x5d   : > { %421 = vmatprep.subr.bf16.mxu1 %v1108_v11  ;;  %628 = vmatprep.subr.bf16.mxu0 %v1110_v12  ;;  %v1125_v21 = vld [vmem:[#allocation5 + $0xc4] ss:$8 sps:$4 sm:$0xff]   ;;  %vm279_vm7 = vcmp.lt.s32.totalorder %v1471_v17, 13  ;;  %vm239_vm8 = vcmp.lt.s32.totalorder %v1468_v10, 7  ;;  %vm243_vm10 = vcmp.lt.s32.totalorder %v1471_v17, 15  ;;  %vm248_vm11 = vcmp.lt.s32.totalorder %v1468_v10, 1 }
  0x5e   : > { %v1480_v22 = vld [vmem:[%s1455_s6] sm:$0xff]  ;;  %v1483_v23 = vld [vmem:[%s1455_s6 + $0x8] sm:$0xff]  ;;  %vm251_vm12 = vcmp.ge.s32.totalorder %v1468_v10, 1  ;;  %vm293_vm13 = vcmp.lt.s32.totalorder %v1468_v10, 4  ;;  %vm297_vm14 = vcmp.lt.s32.totalorder %v1471_v17, 12  ;;  %vm300_vm15 = vcmp.ge.s32.totalorder %v1468_v10, 4 }
  0x5f   : > { %v255_v24 = vrot.slane %v1480_v22, 2  ;;  %v256_v25 = vrot.slane %v1483_v23, 2  ;;  %v264_v26 = vrot.slane %v1480_v22, 6  ;;  %v265_v27 = vrot.slane %v1483_v23, 6  ;;  %v963_v28 = vld [vmem:[%s1659_s1 + $0x4] ss:$0 sm:$0xff] }
  0x60   : > { %422 = vmatpush1.bf16.msra.mxu1 %v1112_v13  ;;  %629 = vmatpush1.bf16.msra.mxu0 %v1113_v14  ;;  %v965_v29 = vld [vmem:[%s1659_s1 + $0x5] ss:$0 sm:$0xff]  ;;  %v967_v30 = vld [vmem:[%s1659_s1 + $0x6] ss:$0 sm:$0xff]  ;;  %v273_v31 = vrot.slane %v1480_v22, 3  ;;  %v274_v32 = vrot.slane %v1483_v23, 3 }
  0x61   : > { %423 = vmatprep.subr.bf16.mxu1 %v1114_v15  ;;  %630 = vmatprep.subr.bf16.mxu0 %v1116_v16  ;;  %v258_v33 = vsel %vm257_vm0, %v255_v24, %v256_v25  ;;  %v259_v34 = vsel %vm257_vm0, %v256_v25, %v255_v24  ;;  %v267_v35 = vsel %vm266_vm1, %v264_v26, %v265_v27  ;;  %v282_v36 = vrot.slane %v1480_v22, 5  ;;  %v989_v41 = vld [vmem:[%s1659_s1 + $0x9] ss:$0 sm:$0xff]  ;;  %v987_v49 = vld [vmem:[%s1659_s1 + $0x8] ss:$0 sm:$0xff]  ;;  %s1022_s25 = sshll.u32 %s1327_s19, 5 }
  0x62   : > { %v263_v37 = vsel %vm261_vm6, %v259_v34, 0.0  ;;  %v268_v38 = vsel %vm266_vm1, %v265_v27, %v264_v26  ;;  %v345_v39 = vmul.f32 %v963_v28, %v267_v35  ;;  %v351_v40 = vmul.f32 %v965_v29, %v1480_v22  ;;  %v991_v50 = vld [vmem:[%s1659_s1 + $0xa] ss:$0 sm:$0xff]  ;;  %v1128_v7 = vld [vmem:[#allocation5 + $0x14] ss:$8 sps:$4 sm:$0xff]   ;;  %s230_s14 = scalar_lea.vmem [#allocation7], %s958_s8  ;;  %s1614_s21 = scalar_lea.hbm %s1662_s4, %s1022_s25 }
  0x63   : > { %v271_v42 = vsel %vm269_vm2, %v268_v38, 0.0  ;;  %v352_v43 = vmul.f32 %v965_v29, %v1483_v23  ;;  %v361_v44 = vmul.f32 %v967_v30, %v263_v37  ;;  %v360_v46 = vmul.f32 %v967_v30, %v258_v33  ;;  %v1120_v5 = vld [vmem:[#allocation5] ss:$8 sps:$4 sm:$0xff]   ;;  %v1004_v33 = vld [vmem:[%s1659_s1 + $0xd] ss:$0 sm:$0xff]  ;;  %s868_s20 = sshll.u32 %s230_s14, 4  ;;  %s1616_s20 = int_to_ptr.vmem [resolvable:$true] %s868_s20 }
  0x64   : > { %424 = vmatpush1.bf16.msra.mxu1 %v1118_v18  ;;  %631 = vmatpush1.bf16.msra.mxu0 %v1119_v19  ;;  %v344_v45 = vmul.f32 %v963_v28, %v271_v42  ;;  %v277_v47 = vsel %vm275_vm3, %v274_v32, %v273_v31  ;;  %v283_v48 = vrot.slane %v1483_v23, 5  ;;  %v276_v52 = vsel %vm275_vm3, %v273_v31, %v274_v32  ;;  %v959_v14 = vld [vmem:[%s1659_s1] ss:$0 sm:$0xff]  ;;  %v960_v15 = vld [vmem:[%s1659_s1 + $0x1] ss:$0 sm:$0xff]  ;;  %s854_s23 = scalar_lea.sflag [#allocation4], %s1451_s11 }
  0x65   : > { %503 = vmatprep.subr.bf16.mxu1 %v1122_v20  ;;  %749 = vmatprep.subr.bf16.mxu0 %v1125_v21  ;;  %v354_v51 = vadd.f32 %v352_v43, %v345_v39  ;;  %v281_v53 = vsel %vm279_vm7, %v277_v47, 0.0  ;;  %v560_v54 = vmul.f32 %v989_v41, %v1483_v23  ;;  %v559_v58 = vmul.f32 %v989_v41, %v1480_v22  ;;  %v1123_v20 = vld [vmem:[#allocation5 + $0xc0] ss:$8 sps:$4 sm:$0xff]   ;;  %v1126_v28 = vld [vmem:[#allocation5 + $0x10] ss:$8 sps:$4 sm:$0xff]   ;;  %s1202_s12 = scalar_lea.vmem %s1616_s20, 32 }
  0x66   : > { %v353_v55 = vadd.f32 %v351_v40, %v344_v45  ;;  %v285_v56 = vsel %vm284_vm4, %v282_v36, %v283_v48  ;;  %v286_v57 = vsel %vm284_vm4, %v283_v48, %v282_v36  ;;  %v569_v62 = vmul.f32 %v991_v50, %v281_v53  ;;  %v961_v27 = vld [vmem:[%s1659_s1 + $0x2] ss:$0 sm:$0xff]  ;;  %v1131_v35 = vld [vmem:[#allocation5 + $0xd4] ss:$8 sps:$4 sm:$0xff]   ;;  %v1134_v36 = vld [vmem:[#allocation5 + $0x24] ss:$8 sps:$4 sm:$0xff]   ;;  %p1203_p4 = scmp.ne.s32.totalorder %s1616_s20, %s1202_s12 }
  0x67   : > { %v363_v59 = vadd.f32 %v361_v44, %v354_v51  ;;  %v289_v60 = vsel %vm287_vm5, %v286_v57, 0.0  ;;  %v553_v61 = vmul.f32 %v987_v49, %v285_v56  ;;  %v568_v2 = vmul.f32 %v991_v50, %v276_v52  ;;  %v1002_v42 = vld [vmem:[%s1659_s1 + $0xc] ss:$0 sm:$0xff]  ;;  %v1132_v47 = vld [vmem:[#allocation5 + $0x20] ss:$8 sps:$4 sm:$0xff]   ;;  %s1280_s19 = smov [#allocation7]  }
  0x68   : > { %v362_v63 = vadd.f32 %v360_v46, %v353_v55  ;;  %v552_v1 = vmul.f32 %v987_v49, %v289_v60  ;;  %v237_v4 = vrot.slane %v1480_v22, 1  ;;  %v238_v8 = vrot.slane %v1483_v23, 1  ;;  %v1129_v46 = vld [vmem:[#allocation5 + $0xd0] ss:$8 sps:$4 sm:$0xff]   ;;  %v1006_v51 = vld [vmem:[%s1659_s1 + $0xe] ss:$0 sm:$0xff]  ;;  %p1204_p6 = pnand %p1203_p4, %p1400_p12 }
  0x69   : > { %v562_v6 = vadd.f32 %v560_v54, %v553_v61  ;;  %v246_v12 = vrot.slane %v1480_v22, 7  ;;  %v247_v13 = vrot.slane %v1483_v23, 7  ;;  %v316_v19 = vmul.f32 %v960_v15, %v1480_v22  ;;  %v1137_v52 = vld [vmem:[#allocation5 + $0xe4] ss:$8 sps:$4 sm:$0xff]   ;;  %v1135_v61 = vld [vmem:[#allocation5 + $0xe0] ss:$8 sps:$4 sm:$0xff]  }
  0x6a   : > { %v364_v9 = vpack.c.bf16 %v363_v59, %v362_v63  ;;  %v561_v11 = vadd.f32 %v559_v58, %v552_v1  ;;  %v241_v18 = vsel %vm239_vm8, %v238_v8, %v237_v4  ;;  %v240_v29 = vsel %vm239_vm8, %v237_v4, %v238_v8  ;;  %v1143_v17 = vld [vmem:[#allocation5 + $0xf4] ss:$8 sps:$4 sm:$0xff]   ;;  %v796_v8 = vld [vmem:[%s1661_s3] sm:$0x3]  ;;  %p1205_p8 = pneg %p1204_p6  ;;  %s1206_s13 = sshll.u32 %s1280_s19, 4  ;;  %s1207_s13 = int_to_ptr.vmem [resolvable:$false] %s1206_s13 }
  0x6b   : > { %v571_v16 = vadd.f32 %v569_v62, %v562_v6  ;;  %v245_v24 = vsel %vm243_vm10, %v241_v18, 0.0  ;;  %v249_v25 = vsel %vm248_vm11, %v246_v12, %v247_v13  ;;  %v250_v26 = vsel %vm248_vm11, %v247_v13, %v246_v12  ;;  %v1138_v62 = vld [vmem:[#allocation5 + $0x30] ss:$8 sps:$4 sm:$0xff]   ;;  %s1208_s9 = scalar_lea.vmem %s1207_s13, 64  ;;  %p1209_p10 = scmp.lt.s32.totalorder %s1616_s20, %s1207_s13 }
  0x6c   : > { %976 = vmatmul.mubr.msk.bf16.vlgmr.msra.gmra.mrb[0].mxu1 %vm413_vm9, %v364_v9  ;;  %v570_v21 = vadd.f32 %v568_v2, %v561_v11  ;;  %v253_v30 = vsel %vm251_vm12, %v250_v26, 0.0  ;;  %v310_v31 = vmul.f32 %v959_v14, %v249_v25  ;;  %v317_v32 = vmul.f32 %v960_v15, %v1483_v23  ;;  %p1210_p13 = scmp.lt.s32.totalorder %s1208_s9, %s1202_s12 }
  0x6d   : > { %504 = vmatpush1.bf16.msra.mxu1 %v1120_v5  ;;  %535 = vmatprep.mubr.bf16.mxu1 %v1278_v0  ;;  %v309_v37 = vmul.f32 %v959_v14, %v253_v30  ;;  %v291_v38 = vrot.slane %v1480_v22, 4  ;;  %v326_v40 = vmul.f32 %v961_v27, %v245_v24  ;;  %v292_v41 = vrot.slane %v1483_v23, 4  ;;  %v1141_v5 = vld [vmem:[#allocation5 + $0xf0] ss:$8 sps:$4 sm:$0xff]  }
  0x6e   : > { %v572_v34 = vpack.c.bf16 %v571_v16, %v570_v21  ;;  %505 = vmatprep.subr.bf16.mxu1 %v1128_v7  ;;  %v319_v39 = vadd.f32 %v317_v32, %v310_v31  ;;  %v325_v44 = vmul.f32 %v961_v27, %v240_v29  ;;  %v685_v45 = vmul.f32 %v1004_v33, %v1483_v23  ;;  %v1140_v23 = vld [vmem:[#allocation5 + $0x34] ss:$8 sps:$4 sm:$0xff]   ;;  %p1211_p3 = por %p1210_p13, %p1209_p10 }
  0x6f   : > { %v318_v43 = vadd.f32 %v316_v19, %v309_v37  ;;  %v294_v48 = vsel %vm293_vm13, %v291_v38, %v292_v41  ;;  %v295_v49 = vsel %vm293_vm13, %v292_v41, %v291_v38  ;;  %v684_v50 = vmul.f32 %v1004_v33, %v1480_v22 }
  0x70   : > { %1000 = vmatmul.mubr.msk.bf16.vlgmr.msra.gmra.mrb[0].mxu0 %vm413_vm9, %v572_v34  ;;  %v299_v53 = vsel %vm297_vm14, %v295_v49, 0.0  ;;  %v302_v54 = vsel %vm300_vm15, %v295_v49, 0.0  ;;  %v678_v55 = vmul.f32 %v1002_v42, %v294_v48  ;;  %v328_v56 = vadd.f32 %v326_v40, %v319_v39  ;;  %p1212_p7 = pnand %p1211_p3, %p1205_p8 }
  0x71   : > { %750 = vmatpush1.bf16.msra.mxu0 %v1123_v20  ;;  %506 = vmatpush1.bf16.msra.mxu1 %v1126_v28  ;;  %v677_v57 = vmul.f32 %v1002_v42, %v302_v54  ;;  %v327_v22 = vadd.f32 %v325_v44, %v318_v43  ;;  %v693_v59 = vmul.f32 %v1006_v51, %v294_v48  ;;  %v800_v6 = vsub.s32 0, %v1468_v10 }
  0x72   : > { %751 = vmatprep.subr.bf16.mxu0 %v1131_v35  ;;  %507 = vmatprep.subr.bf16.mxu1 %v1134_v36  ;;  %v687_v58 = vadd.f32 %v685_v45, %v678_v55  ;;  %v694_v60 = vmul.f32 %v1006_v51, %v299_v53  ;;  %v804_v9 = vsub.s32 1, %v1468_v10  ;;  %v1279_v41 = vmov 1966171168  }
  0x73   : > { %781 = vmatprep.mubr.bf16.mxu0 %v1278_v0  ;;  %v686_v63 = vadd.f32 %v684_v50, %v677_v57  ;;  %v329_v1 = vpack.c.bf16 %v328_v56, %v327_v22  ;;  %v801_v13 = vrot.slane %v796_v8, %v800_v6  ;;  %v834_v42 = vunpack.c.l.s4 %v1279_v41 }
  0x74   : > { %v696_v4 = vadd.f32 %v694_v60, %v687_v58  ;;  %v805_v16 = vrot.slane %v796_v8, %v804_v9  ;;  %vm850_vm0 = vcmp.lt.s32.totalorder %v234_v3, 256 }
  0x75   : > { %752 = vmatpush1.bf16.msra.mxu0 %v1129_v46  ;;  %508 = vmatpush1.bf16.msra.mxu1 %v1132_v47  ;;  %v695_v2 = vadd.f32 %v693_v59, %v686_v63  ;;  %v835_v47 = vunpack.c.0.s8 %v834_v42 }
  0x76   : > { %753 = vmatprep.subr.bf16.mxu0 %v1137_v52  ;;  %509 = vmatprep.subr.bf16.mxu1 %v1140_v23 }
  0x77   : > { %v697_v0 = vpack.c.bf16 %v696_v4, %v695_v2  ;;  %v838_v52 = vsub.s32 %v835_v47, %v1468_v10 }
  0x79   : > { %754 = vmatpush1.bf16.msra.mxu0 %v1135_v61  ;;  %510 = vmatpush1.bf16.msra.mxu1 %v1138_v62 }
  0x7a   : > { %755 = vmatprep.subr.bf16.mxu0 %v1143_v17 }
  0x7c   : > { %985 = vmatmul.mubr.msk.bf16.vlgmr.msra.gmra.mrb[0].mxu1 %vm413_vm9, %v329_v1 }
  0x7d   : > { %756 = vmatpush1.bf16.msra.mxu0 %v1141_v5 }
  0x80   : > { %1015 = vmatmul.mubr.msk.bf16.vlgmr.msra.gmra.mrb[0].mxu0 %vm413_vm9, %v697_v0 }
 0x14f   : > { %v537_v7 = vpop.f32.mrb[0].mxu1 }
 0x150   : > { %v539_v11 = vpop.f32.mrb[1].mxu1 }
 0x151   : > { %v541_v12 = vpop.f32.mrb[2].mxu1 }
 0x152   : > { %v543_v14 = vpop.f32.mrb[3].mxu1 }
 0x153   : > { %v783_v15 = vpop.f32.mrb[0].mxu0 }
 0x154   : > { %v1023_v18 = vadd.f32 %v783_v15, %v537_v7  ;;  %v785_v19 = vpop.f32.mrb[1].mxu0 }
 0x155   : > { %v1024_v20 = vadd.f32 %v785_v19, %v539_v11  ;;  %v787_v21 = vpop.f32.mrb[2].mxu0 }
 0x156   : > { %v808_v24 = vadd.f32 %v1023_v18, %v801_v13  ;;  %v1025_v25 = vadd.f32 %v787_v21, %v541_v12  ;;  %v789_v26 = vpop.f32.mrb[3].mxu0 }
 0x157   : > { %v809_v27 = vadd.f32 %v1024_v20, %v805_v16  ;;  %v1026_v28 = vadd.f32 %v789_v26, %v543_v14 }
 0x158   : > { %v810_v29 = vadd.f32 %v1025_v25, %v801_v13  ;;  %v812_v31 = vmax.f32 %v808_v24, 0.0 }
 0x159   : > { %v811_v30 = vadd.f32 %v1026_v28, %v805_v16  ;;  %v813_v33 = vmax.f32 %v809_v27, 0.0 }
 0x15a   : > { %v814_v32 = vmax.f32 %v810_v29, 0.0 }
 0x15b   : > { %v815_v34 = vmax.f32 %v811_v30, 0.0 }
 0x15c   : > { %v816_v35 = vmax.f32 %v812_v31, %v814_v32 }
 0x15d   : > { %v823_v36 = vmax.f32 %v813_v33, %v815_v34 }
 0x15e   : > { %v817_v37 = vrot.slane %v816_v35, 4 }
 0x15f   : > { %v824_v38 = vrot.slane %v823_v36, 4 }
 0x160   : > { %v818_v39 = vmax.f32 %v816_v35, %v817_v37 }
 0x161   : > { %v825_v40 = vmax.f32 %v823_v36, %v824_v38 }
 0x162   : > { %v819_v43 = vrot.slane %v818_v39, 2 }
 0x163   : > { %v826_v44 = vrot.slane %v825_v40, 2 }
 0x164   : > { %v820_v45 = vmax.f32 %v818_v39, %v819_v43 }
 0x165   : > { %v827_v46 = vmax.f32 %v825_v40, %v826_v44 }
 0x166   : > { %v821_v48 = vrot.slane %v820_v45, 1 }
 0x167   : > { %v828_v49 = vrot.slane %v827_v46, 1 }
 0x168   : > { %v822_v50 = vmax.f32 %v820_v45, %v821_v48 }
 0x169   : > { %v829_v51 = vmax.f32 %v827_v46, %v828_v49 }
 0x16b   : > { %v832_v23 = vcombine.low %v822_v50, %v829_v51 }
 0x16d   : > { %v839_v53 = vrot.slane %v832_v23, %v838_v52 }
 0x16f   : > { %v846_v54 = vrot.slane %v839_v53, %v838_v52 }
 0x171   : > { %852 = vst.msk [vmem:[%s230_s14] sm:$0x3] %vm850_vm0, %v846_v54 }
 0x172   : > { %1215 = shalt.err (!%p1212_p7)
}
 0x173   : > { %s1216_s11 = scalar_lea.hbm %s1614_s21, 32  ;;  %s1220_s10 = scalar_lea.hbm %s1662_s4, 64 }
 0x174   : > { %p1217_p9 = scmp.ne.s32.totalorder %s1614_s21, %s1216_s11  ;;  %p1221_p5 = scmp.lt.u32.totalorder %s1614_s21, %s1662_s4 }
 0x175   : > { %p1222_p11 = scmp.lt.u32.totalorder %s1220_s10, %s1216_s11  ;;  %p1224_p4 = scmp.lt.u32.totalorder %s1216_s11, %s1614_s21 }
 0x176   : > { %p1218_p1 = pnand %p1217_p9, %p1400_p12 }
 0x177   : > { %p1223_p2 = por %p1222_p11, %p1221_p5 }
 0x178   : > { %p1219_p0 = pneg %p1218_p1 }
 0x179   : > { %p1225_p6 = por %p1224_p4, %p1223_p2 }
 0x17b   : > { %p1226_p8 = pnand %p1225_p6, %p1219_p0 }
 0x17d   : > { %1229 = shalt.err (!%p1226_p8)
}
 0x17e   : > { %1041 = dma.vmem_to_hbm [thread:$0]  (%p1400_p12), %s1616_s20, 32, %s1614_s21, %s854_s23  }
 0x17f PF: > { %s880_s8 = sand.u32 1, %s1260_s15   ;;  %p1677_p10 = scmp.ne.s32.totalorder %s1667_s22, 0 }
 0x180   : > { %p1678_p13 = scmp.ge.s32.totalorder %s1272_s18, 2  ;;  %s881_s25 = scalar_lea.sflag [#allocation4], %s880_s8 }
 0x182   : > { %p1052_p3 = pnand %p1678_p13, %p1677_p10 }
 0x184   : > { %1255 = dma.done.wait (!%p1052_p3), %s881_s25, 32  }
 0x185   : > { %1257 = vsyncadd (!%p1052_p3), %s881_s25, 4294967264  ;;  %p18_p7 = scmp.ge.s32.totalorder %s1362_s27, 4   ;;  %s1679_s15 = smov %s1264_s16 }
 0x186   : > { %s1680_s16 = smov %s1268_s17  ;;  %s1681_s17 = smov %s1396_s24 }
 0x187   : > { %s1682_s18 = smov %s1362_s27  ;;  %20 = sbr.rel (!%p18_p7) target bundleno = 6 (0x6), region = 88 }
 0x18e   :  { %886 = vsyncpa [#allocation3], 1 }
 0x18f   :  { %888 = vsyncpa [#allocation3 + $0x1], 1 }
 0x190   :  { %889 = vsyncpa [#allocation6], 1 }
 0x191   :  { %890 = vsyncpa [#allocation4], 1 }
 0x192   :  { %892 = vsyncpa [#allocation4 + $0x1], 1 }

</bundles_post_ra>
